<compile_context>
chip_gen: v7x
topology: tpu7x:2x2x1
jax: 0.10.0
libtpu: 0.0.40
codegen_flags: <defaults>
</compile_context>

<pallas_src>
import functools

import jax
import jax.numpy as jnp
from jax import lax
from jax.experimental import pallas as pl
from jax.experimental.pallas import tpu as pltpu

LANES = 128
MAX_TILE_ROWS = 8192              # (8192,128) f32 block = 4 MiB per buffer
NUM_PARTITIONS = 2                # leading "parallel" grid axis (both TCs on v7x)
VMEM_LIMIT_BYTES = 32 * 1024 * 1024  # 2 inputs x 2 bufs x 4 MiB = 16 MiB + slack


def _round_up(x, m):
    return (x + m - 1) // m * m


def _sublane_packing(dtype):
    # sublane tile rows: 8 for 32-bit, 16 for bf16/f16, 32 for int8/fp8
    return 8 * max(1, 4 // jnp.dtype(dtype).itemsize)


def _focal_loss_kernel(x_ref, t_ref, out_ref, *, gamma, tile_rows,
                       blocks_per_part, blocks_total, full_rows, rem,
                       binary_targets):
    c = pl.program_id(0)           # partition (TensorCore half on v7x)
    i = pl.program_id(1)           # reduction step within the partition

    @pl.when(i == 0)
    def _():
        out_ref[...] = jnp.zeros_like(out_ref)

    blk = c * blocks_per_part + i  # logical (unclamped) block id

    # Fully-clamped duplicate blocks (blk >= blocks_total) contribute nothing:
    # skip all VPU/EUP work for them (the DMA still issues via BlockSpec).
    @pl.when(blk < blocks_total)
    def _():
        x = x_ref[...].astype(jnp.float32)   # cast in-kernel (free on VPU)
        t = t_ref[...].astype(jnp.float32)

        # Numerically stable BCE-with-logits (matches torch):
        #   bce = max(x, 0) - x*t + log(1 + exp(-|x|))
        e = jnp.exp(-jnp.abs(x))
        bce = jnp.maximum(x, 0.0) - x * t + jnp.log1p(e)
        if binary_targets:
            # Exact for t in {0,1}: exp(-bce) == where(x*(2t-1)>=0, 1, e)/(1+e).
            # Saves one EUP transcendental and breaks the exp->log1p->exp chain.
            signed = x * (2.0 * t - 1.0)
            pt = jnp.where(signed >= 0.0, 1.0, e) * pl.reciprocal(1.0 + e)
        else:
            pt = jnp.exp(-bce)
        q = 1.0 - pt
        if float(gamma) == float(int(gamma)):
            mod = lax.integer_pow(q, int(gamma))   # VPU multiplies, no EUP pow
        else:
            mod = q ** jnp.float32(gamma)
        f = mod * bce            # alpha hoisted to the wrapper (exact: linear)

        def accumulate(v):
            # Reshape groups native (8,128) tiles, so the axis-0 sum is pure
            # elementwise vreg adds (VPU only, no per-step XLU reduce).
            out_ref[0] += v.reshape(tile_rows // 8, 8, LANES).sum(axis=0)

        # Interior blocks are fully valid -> accumulate unmasked (no iota work).
        fully_valid = (blk + 1) * tile_rows <= full_rows

        @pl.when(fully_valid)
        def _():
            accumulate(f)

        @pl.when(jnp.logical_not(fully_valid))
        def _():
            # Edge block: mask padded rows / ragged last lane-row in-kernel.
            row_ids = blk * tile_rows + lax.broadcasted_iota(
                jnp.int32, (tile_rows, LANES), 0)
            valid = row_ids < full_rows
            if rem:
                lane_ids = lax.broadcasted_iota(
                    jnp.int32, (tile_rows, LANES), 1)
                valid = valid | ((row_ids == full_rows) & (lane_ids < rem))
            accumulate(jnp.where(valid, f, 0.0))


def focal_loss(inputs, targets, alpha=0.25, gamma=3, reduction="mean",
               assume_binary_targets=False):
    """Pallas TPU focal loss. inputs: logits; targets: same shape.

    assume_binary_targets=True enables an exact fast path for targets in {0,1}
    that drops one EUP transcendental per element.
    """
    assert inputs.shape == targets.shape
    n_elem = inputs.size

    x = jnp.ravel(inputs)                 # keep native dtype; cast in-kernel
    t = jnp.ravel(targets)

    rows = pl.cdiv(n_elem, LANES)
    pad = rows * LANES - n_elem
    if pad:                               # tiny (<128 elem) pad only when the
        x = jnp.pad(x, (0, pad))          # flat size is not lane-aligned
        t = jnp.pad(t, (0, pad))
    x2 = x.reshape(rows, LANES)
    t2 = t.reshape(rows, LANES)

    # Round the tile to the dtype's sublane packing (8 f32 / 16 bf16 / 32 i8).
    packing = max(_sublane_packing(x2.dtype), _sublane_packing(t2.dtype))
    tile_rows = min(MAX_TILE_ROWS, _round_up(rows, packing))
    blocks_total = pl.cdiv(rows, tile_rows)
    blocks_per_part = pl.cdiv(blocks_total, NUM_PARTITIONS)

    kernel = functools.partial(
        _focal_loss_kernel,
        gamma=gamma, tile_rows=tile_rows,
        blocks_per_part=blocks_per_part, blocks_total=blocks_total,
        full_rows=n_elem // LANES, rem=n_elem % LANES,
        binary_targets=bool(assume_binary_targets))

    def in_map(c, i):
        # Clamp so the DMA never walks past the array; a duplicated (clamped)
        # block skips compute in-kernel via the blk < blocks_total guard.
        return (jnp.minimum(c * blocks_per_part + i, blocks_total - 1), 0)

    in_spec = pl.BlockSpec((tile_rows, LANES), in_map)
    # NOTE: Buffered(2) (default) already covers the DMA at 4 MiB blocks; do
    # not deepen the pipeline unless a trace shows exposed copy-in.

    partials = pl.pallas_call(
        kernel,
        out_shape=jax.ShapeDtypeStruct((NUM_PARTITIONS, 8, LANES), jnp.float32),
        grid_spec=pltpu.PrefetchScalarGridSpec(
            num_scalar_prefetch=0,
            grid=(NUM_PARTITIONS, blocks_per_part),
            in_specs=[in_spec, in_spec],
            out_specs=pl.BlockSpec((1, 8, LANES), lambda c, i: (c, 0, 0)),
        ),
        compiler_params=pltpu.CompilerParams(
            dimension_semantics=("parallel", "arbitrary"),
            vmem_limit_bytes=VMEM_LIMIT_BYTES),
    )(x2, t2)

    # Single tiny final reduction; alpha hoisted out of the kernel (exact).
    total = jnp.float32(alpha) * jnp.sum(partials)
    if reduction == "mean":
        return total / jnp.float32(n_elem)
    elif reduction == "sum":
        return total
    else:
        # TODO(synk): 'none' (per-element loss map) is not fused into this
        # reduction kernel; only 'mean' and 'sum' are supported here.
        raise NotImplementedError("only 'mean' and 'sum' reductions supported")


def _focal_loss_ref(inputs, targets, alpha=0.25, gamma=3):
    x = inputs.astype(jnp.float32)
    t = targets.astype(jnp.float32)
    bce = jnp.maximum(x, 0.0) - x * t + jnp.log1p(jnp.exp(-jnp.abs(x)))
    pt = jnp.exp(-bce)
    return jnp.mean(alpha * (1.0 - pt) ** gamma * bce)


if __name__ == "__main__":
    key = jax.random.PRNGKey(0)
    k1, k2 = jax.random.split(key)

    # small shape consistent with a conv-style NCHW logits map
    shape = (2, 4, 16, 16)
    logits = jax.random.normal(k1, shape, dtype=jnp.float32) * 2.0
    targets = (jax.random.uniform(k2, shape) > 0.5).astype(jnp.float32)

    ref = _focal_loss_ref(logits, targets, alpha=0.25, gamma=3)

    # General path (matches torch for arbitrary targets in [0,1]).
    out = focal_loss(logits, targets, alpha=0.25, gamma=3, reduction="mean")
    out = jax.block_until_ready(out)
    assert jnp.allclose(out, ref, rtol=1e-5, atol=1e-6), (out, ref)

    # Binary-targets fast path (one fewer EUP transcendental per element).
    out_fast = focal_loss(logits, targets, alpha=0.25, gamma=3,
                          reduction="mean", assume_binary_targets=True)
    out_fast = jax.block_until_ready(out_fast)
    assert jnp.allclose(out_fast, ref, rtol=1e-4, atol=1e-5), (out_fast, ref)

    print("KERNEL_OK")
</pallas_src>

<mosaic_0001>
module attributes {stable_mosaic.version = 11 : i64} {
  func.func @_focal_loss_kernel(%arg0: i32, %arg1: i32, %arg2: memref<16x128xf32, #tpu.memory_space<vmem>>, %arg3: memref<16x128xf32, #tpu.memory_space<vmem>>, %arg4: memref<1x8x128xf32, #tpu.memory_space<vmem>>) attributes {dimension_semantics = [#tpu.dimension_semantics<parallel>, #tpu.dimension_semantics<arbitrary>], iteration_bounds = array<i64: 2, 1>, scalar_prefetch = 0 : i64, scratch_operands = 0 : i64, tpu.core_type = #tpu.core_type<tc>, window_params = [{transform_indices = @transform_0, window_bounds = array<i64: 16, 128>}, {transform_indices = @transform_1, window_bounds = array<i64: 16, 128>}, {transform_indices = @transform_2, window_bounds = array<i64: 1, 8, 128>}]} {
    %c0_i32 = arith.constant 0 : i32
    %0 = arith.cmpi eq, %arg1, %c0_i32 : i32
    %1 = arith.extui %0 : i1 to i32
    %c0_i32_0 = arith.constant 0 : i32
    %2 = arith.cmpi ne, %1, %c0_i32_0 : i32
    scf.if %2 {
      %cst = arith.constant 0.000000e+00 : f32
      %8 = vector.broadcast %cst : f32 to vector<1x8x128xf32>
      %c0 = arith.constant 0 : index
      %c0_3 = arith.constant 0 : index
      %c0_4 = arith.constant 0 : index
      %9 = vector.load %arg4[%c0, %c0_3, %c0_4] : memref<1x8x128xf32, #tpu.memory_space<vmem>>, vector<1x8x128xf32>
      tpu.vector_store %arg4[%c0, %c0_3, %c0_4], %8 {strides = array<i32>} : memref<1x8x128xf32, #tpu.memory_space<vmem>>, vector<1x8x128xf32>,
    } else {
    }
    %c1_i32 = arith.constant 1 : i32
    %3 = arith.muli %arg0, %c1_i32 : i32
    %4 = arith.addi %3, %arg1 : i32
    %c1_i32_1 = arith.constant 1 : i32
    %5 = arith.cmpi slt, %4, %c1_i32_1 : i32
    %6 = arith.extui %5 : i1 to i32
    %c0_i32_2 = arith.constant 0 : i32
    %7 = arith.cmpi ne, %6, %c0_i32_2 : i32
    scf.if %7 {
      %c0 = arith.constant 0 : index
      %c0_3 = arith.constant 0 : index
      %8 = vector.load %arg2[%c0, %c0_3] : memref<16x128xf32, #tpu.memory_space<vmem>>, vector<16x128xf32>
      %c0_4 = arith.constant 0 : index
      %c0_5 = arith.constant 0 : index
      %9 = vector.load %arg3[%c0_4, %c0_5] : memref<16x128xf32, #tpu.memory_space<vmem>>, vector<16x128xf32>
      %10 = math.absf %8 : vector<16x128xf32>
      %cst = arith.constant 0.000000e+00 : f32
      %11 = vector.broadcast %cst : f32 to vector<16x128xf32>
      %12 = arith.subf %11, %10 : vector<16x128xf32>
      %13 = math.exp %12 : vector<16x128xf32>
      %cst_6 = arith.constant 0.000000e+00 : f32
      %14 = vector.broadcast %cst_6 : f32 to vector<16x128xf32>
      %15 = arith.maximumf %8, %14 : vector<16x128xf32>
      %16 = arith.mulf %8, %9 : vector<16x128xf32>
      %17 = arith.subf %15, %16 : vector<16x128xf32>
      %18 = math.log1p %13 : vector<16x128xf32>
      %19 = arith.addf %17, %18 : vector<16x128xf32>
      %cst_7 = arith.constant 0.000000e+00 : f32
      %20 = vector.broadcast %cst_7 : f32 to vector<16x128xf32>
      %21 = arith.subf %20, %19 : vector<16x128xf32>
      %22 = math.exp %21 : vector<16x128xf32>
      %cst_8 = arith.constant 1.000000e+00 : f32
      %23 = vector.broadcast %cst_8 : f32 to vector<16x128xf32>
      %24 = arith.subf %23, %22 : vector<16x128xf32>
      %25 = arith.mulf %24, %24 : vector<16x128xf32>
      %26 = arith.mulf %24, %25 : vector<16x128xf32>
      %27 = arith.mulf %26, %19 : vector<16x128xf32>
      %c1_i32_9 = arith.constant 1 : i32
      %28 = arith.addi %4, %c1_i32_9 : i32
      %c16_i32 = arith.constant 16 : i32
      %29 = arith.muli %28, %c16_i32 : i32
      %c16_i32_10 = arith.constant 16 : i32
      %30 = arith.cmpi sle, %29, %c16_i32_10 : i32
      %31 = arith.extui %30 : i1 to i32
      %c0_i32_11 = arith.constant 0 : i32
      %32 = arith.cmpi ne, %31, %c0_i32_11 : i32
      scf.if %32 {
        %c0_13 = arith.constant 0 : index
        %c0_14 = arith.constant 0 : index
        %c0_15 = arith.constant 0 : index
        %36 = vector.load %arg4[%c0_13, %c0_14, %c0_15] : memref<1x8x128xf32, #tpu.memory_space<vmem>>, vector<1x8x128xf32>
        %37 = vector.shape_cast %36 : vector<1x8x128xf32> to vector<8x128xf32>
        %38 = vector.shape_cast %27 : vector<16x128xf32> to vector<2x8x128xf32>
        %cst_16 = arith.constant dense<0.000000e+00> : vector<8x128xf32>
        %39 = vector.multi_reduction <add>, %38, %cst_16 [0] : vector<2x8x128xf32> to vector<8x128xf32>
        %40 = arith.addf %37, %39 : vector<8x128xf32>
        %c0_17 = arith.constant 0 : index
        %c0_18 = arith.constant 0 : index
        %c0_19 = arith.constant 0 : index
        %41 = vector.load %arg4[%c0_17, %c0_18, %c0_19] : memref<1x8x128xf32, #tpu.memory_space<vmem>>, vector<1x8x128xf32>
        %42 = vector.shape_cast %41 : vector<1x8x128xf32> to vector<8x128xf32>
        %43 = vector.shape_cast %40 : vector<8x128xf32> to vector<1x8x128xf32>
        tpu.vector_store %arg4[%c0_17, %c0_18, %c0_19], %43 {strides = array<i32>} : memref<1x8x128xf32, #tpu.memory_space<vmem>>, vector<1x8x128xf32>,
      } else {
      }
      %true = arith.constant true
      %33 = arith.xori %30, %true : i1
      %34 = arith.extui %33 : i1 to i32
      %c0_i32_12 = arith.constant 0 : i32
      %35 = arith.cmpi ne, %34, %c0_i32_12 : i32
      scf.if %35 {
        %c16_i32_13 = arith.constant 16 : i32
        %36 = arith.muli %4, %c16_i32_13 : i32
        %37 = tpu.iota {dimensions = array<i32: 0>} : vector<16x128xi32>
        %38 = vector.broadcast %36 : i32 to vector<16x128xi32>
        %39 = arith.addi %38, %37 : vector<16x128xi32>
        %c16_i32_14 = arith.constant 16 : i32
        %40 = vector.broadcast %c16_i32_14 : i32 to vector<16x128xi32>
        %41 = arith.cmpi slt, %39, %40 : vector<16x128xi32>
        %cst_15 = arith.constant 0.000000e+00 : f32
        %42 = vector.broadcast %cst_15 : f32 to vector<16x128xf32>
        %43 = arith.select %41, %27, %42 : vector<16x128xi1>, vector<16x128xf32>
        %c0_16 = arith.constant 0 : index
        %c0_17 = arith.constant 0 : index
        %c0_18 = arith.constant 0 : index
        %44 = vector.load %arg4[%c0_16, %c0_17, %c0_18] : memref<1x8x128xf32, #tpu.memory_space<vmem>>, vector<1x8x128xf32>
        %45 = vector.shape_cast %44 : vector<1x8x128xf32> to vector<8x128xf32>
        %46 = vector.shape_cast %43 : vector<16x128xf32> to vector<2x8x128xf32>
        %cst_19 = arith.constant dense<0.000000e+00> : vector<8x128xf32>
        %47 = vector.multi_reduction <add>, %46, %cst_19 [0] : vector<2x8x128xf32> to vector<8x128xf32>
        %48 = arith.addf %45, %47 : vector<8x128xf32>
        %c0_20 = arith.constant 0 : index
        %c0_21 = arith.constant 0 : index
        %c0_22 = arith.constant 0 : index
        %49 = vector.load %arg4[%c0_20, %c0_21, %c0_22] : memref<1x8x128xf32, #tpu.memory_space<vmem>>, vector<1x8x128xf32>
        %50 = vector.shape_cast %49 : vector<1x8x128xf32> to vector<8x128xf32>
        %51 = vector.shape_cast %48 : vector<8x128xf32> to vector<1x8x128xf32>
        tpu.vector_store %arg4[%c0_20, %c0_21, %c0_22], %51 {strides = array<i32>} : memref<1x8x128xf32, #tpu.memory_space<vmem>>, vector<1x8x128xf32>,
      } else {
      }
    } else {
    }
    return
  }
  func.func @transform_0(%arg0: i32, %arg1: i32) -> (i32, i32) {
    %c1_i32 = arith.constant 1 : i32
    %0 = arith.muli %arg0, %c1_i32 : i32
    %1 = arith.addi %0, %arg1 : i32
    %c0_i32 = arith.constant 0 : i32
    %2 = arith.minsi %1, %c0_i32 : i32
    %c0_i32_0 = arith.constant 0 : i32
    %c0_i32_1 = arith.constant 0 : i32
    return %2, %c0_i32_0 : i32, i32
  }
  func.func @transform_1(%arg0: i32, %arg1: i32) -> (i32, i32) {
    %c1_i32 = arith.constant 1 : i32
    %0 = arith.muli %arg0, %c1_i32 : i32
    %1 = arith.addi %0, %arg1 : i32
    %c0_i32 = arith.constant 0 : i32
    %2 = arith.minsi %1, %c0_i32 : i32
    %c0_i32_0 = arith.constant 0 : i32
    %c0_i32_1 = arith.constant 0 : i32
    return %2, %c0_i32_0 : i32, i32
  }
  func.func @transform_2(%arg0: i32, %arg1: i32) -> (i32, i32, i32) {
    %c0_i32 = arith.constant 0 : i32
    %c0_i32_0 = arith.constant 0 : i32
    %c0_i32_1 = arith.constant 0 : i32
    return %arg0, %c0_i32, %c0_i32_0 : i32, i32, i32
  }
}

</mosaic_0001>

<bundles_post_ra>
// kernel: tpu_custom_call.1
= control target key start
LH: loop header
LB: loop body
LE: loop exit
PB: predicated region body
PF: predicated region fallthrough
CT: control target
= control target key end

     0   :  { %7 = vsyncpa [#allocation3], 0  ;;  %s992_s0 = inlined_call_operand.hbm [shape: f32[16,128], index: 0, kind: input, shape index: {}]   ;;  %s993_s1 = inlined_call_operand.hbm [shape: f32[16,128], index: 1, kind: input, shape index: {}]   ;;  %s994_s2 = inlined_call_operand.hbm [shape: f32[2,8,128], index: 2, kind: output, shape index: {}]  }
   0x1   :  { %9 = vsyncpa [#allocation3 + $0x1], 0 }
   0x2   :  { %10 = vsyncpa [#allocation6], 0 }
   0x3   :  { %12 = vsyncpa [#allocation6 + $0x1], 0 }
   0x4   :  { %13 = vsyncpa [#allocation4], 0 }
   0x5   :  { %15 = vsyncpa [#allocation4 + $0x1], 0  ;;  %s769_s9 = smov 0   ;;  %s771_s10 = smov 0  }
   0x6   :  { %s773_s11 = smov 0   ;;  %s775_s12 = smov 0  }
   0x7   :  { %s777_s13 = smov 0   ;;  %s779_s14 = smov 0  }
   0x8   :  { %s781_s15 = smov 0   ;;  %s783_s16 = smov 0  }
   0x9 LB: > { %s446_s17 = sadd.s32 4294967295, %s746_s16   ;;  %s447_s18 = sadd.s32 4294967294, %s746_s16   ;;  %s746_s16 = sphi %s783_s16, %s21_s16   ;;  %s742_s15 = sphi %s781_s15, %s1013_s15   ;;  %s738_s14 = sphi %s779_s14, %s1012_s14   ;;  %s734_s13 = sphi %s777_s13, %s982_s13   ;;  %s730_s12 = sphi %s775_s12, %s1011_s12   ;;  %s726_s11 = sphi %s773_s11, %s1010_s11   ;;  %s722_s10 = sphi %s771_s10, %s1009_s10   ;;  %s718_s9 = sphi %s769_s9, %s1008_s9  }
   0xa   : > { %s33_s19 = sadd.s32 1, %s742_s15  ;;  %p715_p1 = scmp.ne.s32.totalorder %s734_s13, 0 }
   0xb   : > { %p35_p0 = scmp.ge.s32.totalorder %s33_s19, 2  ;;  %p54_p2 = scmp.eq.s32.totalorder %s746_s16, 0 }
   0xc   : > { %p59_p3 = scmp.ne.s32.totalorder %s734_s13, %s730_s12  ;;  %p60_p5 = scmp.eq.s32.totalorder %s446_s17, 0 }
   0xd   : > { %s1015_s19 = smov (%p35_p0, %s33_s19), 0  ;;  %p815_p4 = por %p715_p1, %p54_p2 }
   0xe   : > { %p819_p6 = por %p60_p5, %p59_p3  ;;  %s101_s22 = ssub.s32 %s742_s15, %s1015_s19 }
   0xf   : > { %p102_p7 = scmp.eq.s32.totalorder %s101_s22, 0  ;;  %s104_s23 = sadd.s32 1, %s726_s11 }
  0x10   : > { %s998_s21 = scalar_select %p819_p6, 1, 0 }
  0x11   : > { %s827_s24 = scalar_select %p102_p7, %s726_s11, %s104_s23  }
  0x12   : > { %p114_p8 = scmp.ne.s32.totalorder %s726_s11, %s722_s10  ;;  %p115_p9 = scmp.eq.s32.totalorder %s446_s17, 1 }
  0x13   : > { %p120_p10 = scmp.ne.s32.totalorder %s722_s10, %s718_s9  ;;  %p121_p11 = scmp.eq.s32.totalorder %s447_s18, 1 }
  0x14   : > { %p833_p12 = por %p115_p9, %p114_p8  ;;  %p490_p1 = scmp.lt.s32.totalorder %s746_s16, 2 }
  0x15   : > { %p838_p0 = por %p121_p11, %p120_p10  ;;  %s748_s27 = smov [#allocation2]  }
  0x16   : > { %s999_s25 = scalar_select %p833_p12, 1, 0 }
  0x17   : > { %s1000_s26 = scalar_select %p838_p0, 1, 0 }
  0x18   : > { %s155_s28 = sshll.u32 %s748_s27, 4  ;;  %p845_p2 = pnand %p490_p1, %p815_p4  ;;  %s156_s28 = int_to_ptr.vmem [resolvable:$true] %s155_s28 }
  0x19   : > { %s579_s4 = scalar_lea.hbm %s992_s0, 256 }
  0x1a   : > { %p580_p3 = scmp.ne.s32.totalorder %s992_s0, %s579_s4  ;;  %p581_p5 = pneg %p845_p2 }
  0x1b   : > { %p586_p8 = scmp.lt.u32.totalorder %s579_s4, %s579_s4  ;;  %p588_p9 = scmp.lt.u32.totalorder %s579_s4, %s992_s0 }
  0x1c   : > { %p582_p7 = pnand %p581_p5, %p580_p3 }
  0x1d   : > { %p589_p10 = por %p588_p9, %p586_p8 }
  0x1e   : > { %p583_p4 = pneg %p582_p7 }
  0x20   : > { %p590_p11 = pnand %p589_p10, %p583_p4 }
  0x22   : > { %593 = shalt.err (!%p590_p11)
}
  0x23   : > { %s594_s12 = scalar_lea.vmem %s156_s28, 256  ;;  %s601_s17 = scalar_lea.vmem %s156_s28, 512 }
  0x24   : > { %p595_p1 = scmp.ne.s32.totalorder %s156_s28, %s594_s12  ;;  %p602_p12 = scmp.lt.s32.totalorder %s156_s28, %s156_s28 }
  0x25   : > { %p603_p6 = scmp.lt.s32.totalorder %s601_s17, %s594_s12 }
  0x26   : > { %p597_p13 = pnand %p595_p1, %p581_p5 }
  0x27   : > { %p604_p3 = por %p603_p6, %p602_p12 }
  0x28   : > { %p598_p0 = pneg %p597_p13 }
  0x2a   : > { %p605_p7 = pnand %p604_p3, %p598_p0 }
  0x2c   : > { %608 = shalt.err (!%p605_p7)
}
  0x2d   : > { %s749_s18 = smov 128   ;;  %s750_s20 = smov 8  }
  0x2e   : > { %482 = dma.hbm_to_vmem [thread:$0]  (!%p845_p2), %s992_s0, 256, %s156_s28, [#allocation3], %s749_s18, %s749_s18, %s750_s20  }
  0x2f   : > { %p456_p13 = scmp.ge.s32.totalorder %s746_s16, 1  ;;  %p187_p4 = scmp.lt.s32.totalorder %s746_s16, 3 }
  0x30   : > { %s751_s30 = smov [#allocation5]   ;;  %s609_s6 = scalar_lea.hbm %s993_s1, 256 }
  0x31   : > { %p876_p8 = pnand %p456_p13, %p187_p4  ;;  %s179_s3 = sshll.u32 %s751_s30, 4  ;;  %s180_s3 = int_to_ptr.vmem [resolvable:$true] %s179_s3 }
  0x32   : > { %p610_p6 = scmp.ne.s32.totalorder %s993_s1, %s609_s6  ;;  %p616_p9 = scmp.lt.u32.totalorder %s609_s6, %s609_s6 }
  0x33   : > { %s1002_s27 = scalar_select %p876_p8, 1, 0 }
  0x34   : > { %p612_p12 = pnand %p610_p6, %p581_p5  ;;  %p618_p10 = scmp.lt.u32.totalorder %s609_s6, %s993_s1 }
  0x36   : > { %p613_p0 = pneg %p612_p12  ;;  %p619_p11 = por %p618_p10, %p616_p9 }
  0x38   : > { %p620_p1 = pnand %p619_p11, %p613_p0 }
  0x3a   : > { %623 = shalt.err (!%p620_p1)
}
  0x3b   : > { %s624_s17 = scalar_lea.vmem %s180_s3, 256  ;;  %s631_s22 = scalar_lea.vmem %s180_s3, 512 }
  0x3c   : > { %p625_p3 = scmp.ne.s32.totalorder %s180_s3, %s624_s17  ;;  %p632_p4 = scmp.lt.s32.totalorder %s180_s3, %s180_s3 }
  0x3d   : > { %p633_p8 = scmp.lt.s32.totalorder %s631_s22, %s624_s17 }
  0x3e   : > { %p627_p7 = pnand %p625_p3, %p581_p5 }
  0x3f   : > { %p634_p6 = por %p633_p8, %p632_p4 }
  0x40   : > { %p628_p13 = pneg %p627_p7 }
  0x42   : > { %p635_p12 = pnand %p634_p6, %p628_p13 }
  0x44   : > { %638 = shalt.err (!%p635_p12)
}
  0x45   : > { %485 = dma.hbm_to_vmem [thread:$0]  (!%p845_p2), %s993_s1, 256, %s180_s3, [#allocation6], %s749_s18, %s749_s18, %s750_s20  }
  0x46   : > { %p1003_p0 = scmp.ne.s32.totalorder %s1002_s27, 0 }
  0x47   : > { %s193_s4 = sand.u32 (!%p1003_p0), 1, %s734_s13   ;;  %p1004_p5 = scmp.ne.s32.totalorder (!%p1003_p0), %s998_s21, 0 }
  0x48   : > { %191 = sbr.rel (%p1003_p0) target bundleno = 189 (0xbd), region = 28  ;;  %s457_s5 = sshll.u32 (!%p1003_p0), %s193_s4, 4 }
  0x49   : > { %s194_s6 = scalar_lea.sflag (!%p1003_p0), [#allocation3], %s193_s4  ;;  %s197_s7 = scalar_lea.vmem (!%p1003_p0), [#allocation2], %s457_s5 }
  0x4f   : > { %704 = dma.done.wait (%p1004_p5), %s194_s6, 256  }
  0x50   : > { %706 = vsyncadd (%p1004_p5), %s194_s6, 4294967040  ;;  %s203_s29 = scalar_lea.sflag [#allocation6], %s193_s4  ;;  %s910_s8 = scalar_lea.vmem [#allocation5], %s457_s5 }
  0x51   : > { %708 = dma.done.wait (%p1004_p5), %s203_s29, 256  }
  0x52   : > { %710 = vsyncadd (%p1004_p5), %s203_s29, 4294967040  ;;  %s229_s18 = sand.u32 1, %s722_s10   ;;  %v752_v0 = vmov 0.0   ;;  %p460_p2 = scmp.ge.s32.totalorder %s738_s14, 1 }
  0x53   : > { %s459_s20 = sshll.u32 %s229_s18, 3  ;;  %v250_v1 = vld [vmem:[%s197_s7] sm:$0xff] (!%p460_p2)  ;;  %v251_v2 = vld [vmem:[%s197_s7 + $0x8] sm:$0xff] (!%p460_p2)  ;;  %s471_s3 = sshll.u32 (!%p460_p2), %s738_s14, 4 }
  0x54   : > { %s919_s27 = scalar_lea.vmem [#allocation7], %s459_s20  ;;  %249 = sbr.rel (%p460_p2) target bundleno = 164 (0xa4), region = 44  ;;  %v254_v3 = vand.u32 (!%p460_p2), 2147483647, %v250_v1  ;;  %v255_v4 = vand.u32 (!%p460_p2), 2147483647, %v251_v2 }
  0x55   : > { %244 = vst [vmem:[%s919_s27] sm:$0xff] %v752_v0  ;;  %s926_s21 = sadd.s32 (!%p460_p2), 16, %s471_s3  ;;  %v252_v15 = vld [vmem:[%s910_s8] sm:$0xff] (!%p460_p2)  ;;  %v253_v16 = vld [vmem:[%s910_s8 + $0x8] sm:$0xff] (!%p460_p2)  ;;  %v262_v18 = vmax.f32 (!%p460_p2), %v250_v1, 0.0  ;;  %v263_v22 = vmax.f32 (!%p460_p2), %v251_v2, 0.0 }
  0x56   : > { %v256_v5 = vsub.f32 (!%p460_p2), 0.0, %v254_v3  ;;  %v257_v6 = vsub.f32 (!%p460_p2), 0.0, %v255_v4  ;;  %v264_v19 = vmul.f32 (!%p460_p2), %v252_v15, %v250_v1  ;;  %v265_v23 = vmul.f32 (!%p460_p2), %v253_v16, %v251_v2  ;;  %p462_p8 = scmp.gt.s32.totalorder (!%p460_p2), %s926_s21, 16 }
  0x58   : > { %v258_v7 = vmul.f32 (!%p460_p2), 1.442695, %v256_v5  ;;  %v260_v8 = vmul.f32 (!%p460_p2), 1.442695, %v257_v6  ;;  %v266_v27 = vsub.f32 (!%p460_p2), %v262_v18, %v264_v19  ;;  %v267_v30 = vsub.f32 (!%p460_p2), %v263_v22, %v265_v23 }
  0x5a   : > { %567 = vpow2.f32 (!%p460_p2), %v258_v7 }
  0x5b   : > { %569 = vpow2.f32 %v260_v8 }
  0x5c   : > { %v308_v51 = vld [vmem:[%s919_s27] sm:$0xff] (!%p462_p8) }
  0x64   : > { %v568_v9 = vpop.eup %567 }
  0x65   : > { %v570_v10 = vpop.eup %569  ;;  %v268_v11 = vadd.f32 1.0, %v568_v9  ;;  %v271_v13 = vmul.f32 -0.5, %v568_v9  ;;  %v274_v20 = vand.u32 2147483647, %v568_v9 }
  0x66   : > { %v277_v12 = vadd.f32 1.0, %v570_v10  ;;  %v280_v14 = vmul.f32 -0.5, %v570_v10  ;;  %v283_v24 = vand.u32 2147483647, %v570_v10 }
  0x67   : > { %571 = vlog2.f32 %v268_v11  ;;  %v272_v17 = vadd.f32 1.0, %v271_v13  ;;  %vm275_vm0 = vcmp.lt.f32.partialorder %v274_v20, 0.0004427343 }
  0x68   : > { %573 = vlog2.f32 %v277_v12  ;;  %v281_v21 = vadd.f32 1.0, %v280_v14  ;;  %vm284_vm1 = vcmp.lt.f32.partialorder %v283_v24, 0.0004427343 }
  0x69   : > { %v273_v25 = vmul.f32 %v568_v9, %v272_v17 }
  0x6a   : > { %v282_v28 = vmul.f32 %v570_v10, %v281_v21 }
  0x71   : > { %v572_v26 = vpop.eup %571 }
  0x72   : > { %v574_v29 = vpop.eup %573  ;;  %v270_v31 = vmul.f32 0.6931472, %v572_v26 }
  0x73   : > { %v279_v32 = vmul.f32 0.6931472, %v574_v29 }
  0x74   : > { %v276_v33 = vsel %vm275_vm0, %v273_v25, %v270_v31 }
  0x75   : > { %v285_v34 = vsel %vm284_vm1, %v282_v28, %v279_v32  ;;  %v286_v35 = vadd.f32 %v276_v33, %v266_v27 }
  0x76   : > { %v287_v36 = vadd.f32 %v285_v34, %v267_v30 }
  0x77   : > { %v288_v37 = vsub.f32 0.0, %v286_v35 }
  0x78   : > { %v289_v38 = vsub.f32 0.0, %v287_v36 }
  0x79   : > { %v290_v39 = vmul.f32 1.442695, %v288_v37 }
  0x7a   : > { %v292_v40 = vmul.f32 1.442695, %v289_v38 }
  0x7b   : > { %575 = vpow2.f32 %v290_v39 }
  0x7c   : > { %577 = vpow2.f32 %v292_v40 }
  0x85   : > { %v576_v41 = vpop.eup %575 }
  0x86   : > { %v578_v42 = vpop.eup %577  ;;  %v294_v43 = vsub.f32 1.0, %v576_v41 }
  0x87   : > { %v295_v44 = vsub.f32 1.0, %v578_v42  ;;  %307 = sbr.rel (%p462_p8) target bundleno = 148 (0x94), region = 48 }
  0x88   : > { %v296_v45 = vmul.f32 %v294_v43, %v294_v43 }
  0x89   : > { %v297_v46 = vmul.f32 %v295_v44, %v295_v44 }
  0x8a   : > { %v298_v47 = vmul.f32 %v296_v45, %v294_v43 }
  0x8b   : > { %v299_v48 = vmul.f32 %v297_v46, %v295_v44 }
  0x8c   : > { %v300_v49 = vmul.f32 %v298_v47, %v286_v35 }
  0x8d   : > { %v301_v50 = vmul.f32 %v299_v48, %v287_v36 }
  0x8f   : > { %v309_v52 = vadd.f32 %v301_v50, %v300_v49 }
  0x91   : > { %v310_v53 = vadd.f32 %v309_v52, %v308_v51 }
  0x93   : > { %311 = vst [vmem:[%s919_s27] sm:$0xff] %v310_v53 }
  0x94 PF: > { %p463_p9 = scmp.le.s32.totalorder %s926_s21, 16 }
  0x95   : > { %v317_v54 = vlaneseq (!%p463_p9)  ;;  %v320_v55 = vstv (!%p463_p9), %s471_s3 }
  0x96   : > { %315 = sbr.rel (%p463_p9) target bundleno = 164 (0xa4), region = 52 }
  0x97   : > { %v318_v56 = vshrl.u32 (!%p463_p9), %v317_v54, 7 }
  0x99   : > { %v319_v57 = vadd.s32 (!%p463_p9), 8, %v318_v56  ;;  %v321_v58 = vadd.s32 (!%p463_p9), %v320_v55, %v318_v56 }
  0x9a   : > { %v327_v62 = vld [vmem:[%s919_s27] sm:$0xff] (!%p463_p9) }
  0x9b   : > { %v322_v59 = vadd.s32 (!%p463_p9), %v320_v55, %v319_v57  ;;  %vm323_vm2 = vcmp.lt.s32.totalorder (!%p463_p9), %v321_v58, 16 }
  0x9c   : > { %v325_v60 = vsel (!%p463_p9), %vm323_vm2, %v300_v49, 0.0 }
  0x9d   : > { %vm324_vm3 = vcmp.lt.s32.totalorder %v322_v59, 16 }
  0x9e   : > { %v326_v61 = vsel %vm324_vm3, %v301_v50, 0.0 }
  0x9f   : > { %v328_v63 = vadd.f32 %v326_v61, %v325_v60 }
  0xa1   : > { %v329_v0 = vadd.f32 %v328_v63, %v327_v62 }
  0xa3   : > { %330 = vst [vmem:[%s919_s27] sm:$0xff] %v329_v0 }
  0xa4 PF: > { %s466_s28 = sshll.u32 %s738_s14, 7  ;;  %s345_s23 = sshll.u32 %s919_s27, 4  ;;  %s346_s23 = int_to_ptr.vmem [resolvable:$true] %s345_s23 }
  0xa5   : > { %s942_s22 = scalar_lea.hbm %s994_s2, %s466_s28  ;;  %s332_s30 = scalar_lea.sflag [#allocation4], %s229_s18 }
  0xa6   : > { %s639_s4 = scalar_lea.vmem %s346_s23, 128  ;;  %p1005_p11 = scmp.ne.s32.totalorder %s999_s25, 0 }
  0xa7   : > { %p640_p10 = scmp.ne.s32.totalorder %s346_s23, %s639_s4  ;;  %s753_s5 = smov [#allocation7]  }
  0xa8   : > { %s643_s6 = sshll.u32 %s753_s5, 4  ;;  %s644_s6 = int_to_ptr.vmem [resolvable:$false] %s643_s6 }
  0xa9   : > { %p641_p1 = pnand %p640_p10, %p1005_p11  ;;  %s645_s7 = scalar_lea.vmem %s644_s6, 256 }
  0xaa   : > { %p646_p7 = scmp.lt.s32.totalorder %s346_s23, %s644_s6  ;;  %p647_p13 = scmp.lt.s32.totalorder %s645_s7, %s639_s4 }
  0xab   : > { %p642_p3 = pneg %p641_p1 }
  0xac   : > { %p648_p4 = por %p647_p13, %p646_p7 }
  0xae   : > { %p649_p6 = pnand %p648_p4, %p642_p3 }
  0xb0   : > { %652 = shalt.err (!%p649_p6)
}
  0xb1   : > { %s653_s14 = scalar_lea.hbm %s942_s22, 128  ;;  %s657_s18 = scalar_lea.hbm %s994_s2, 256 }
  0xb2   : > { %p654_p12 = scmp.ne.s32.totalorder %s942_s22, %s653_s14  ;;  %p658_p2 = scmp.lt.u32.totalorder %s942_s22, %s994_s2 }
  0xb3   : > { %p659_p8 = scmp.lt.u32.totalorder %s657_s18, %s653_s14  ;;  %p661_p10 = scmp.lt.u32.totalorder %s653_s14, %s942_s22 }
  0xb4   : > { %p655_p0 = pnand %p654_p12, %p1005_p11 }
  0xb5   : > { %p660_p9 = por %p659_p8, %p658_p2 }
  0xb6   : > { %p656_p5 = pneg %p655_p0 }
  0xb7   : > { %p662_p1 = por %p661_p10, %p660_p9 }
  0xb9   : > { %p663_p3 = pnand %p662_p1, %p656_p5 }
  0xbb   : > { %666 = shalt.err (!%p663_p3)
}
  0xbc   : > { %477 = dma.vmem_to_hbm [thread:$0]  (%p1005_p11), %s346_s23, 128, %s942_s22, %s332_s30  }
  0xbd PF: > { %s357_s3 = sand.u32 1, %s718_s9   ;;  %p1006_p7 = scmp.ne.s32.totalorder %s1000_s26, 0 }
  0xbe   : > { %p1007_p13 = scmp.ge.s32.totalorder %s746_s16, 2  ;;  %s358_s21 = scalar_lea.sflag [#allocation4], %s357_s3 }
  0xc0   : > { %p487_p4 = pnand %p1007_p13, %p1006_p7 }
  0xc2   : > { %712 = dma.done.wait (!%p487_p4), %s358_s21, 128  }
  0xc3   : > { %714 = vsyncadd (!%p487_p4), %s358_s21, 4294967168  ;;  %s21_s16 = sadd.s32 1, %s746_s16   ;;  %s1008_s9 = smov %s722_s10 }
  0xc4   : > { %p18_p6 = scmp.ge.s32.totalorder %s21_s16, 4   ;;  %s1009_s10 = smov %s726_s11 }
  0xc5   : > { %s1010_s11 = smov %s827_s24  ;;  %s1011_s12 = smov %s734_s13 }
  0xc6   : > { %s982_s13 = smov 0   ;;  %s1012_s14 = smov %s742_s15 }
  0xc7   : > { %s1013_s15 = smov %s1015_s19  ;;  %20 = sbr.rel (!%p18_p6) target bundleno = 9 (0x9), region = 102 }
  0xce   :  { %363 = vsyncpa [#allocation3], 1 }
  0xcf   :  { %365 = vsyncpa [#allocation3 + $0x1], 1 }
  0xd0   :  { %366 = vsyncpa [#allocation6], 1 }
  0xd1   :  { %368 = vsyncpa [#allocation6 + $0x1], 1 }
  0xd2   :  { %369 = vsyncpa [#allocation4], 1 }
  0xd3   :  { %371 = vsyncpa [#allocation4 + $0x1], 1 }

</bundles_post_ra>
